<compile_context>
chip_gen: v6e
topology: v6e:2x2x1
jax: 0.10.0
libtpu: 0.0.40
codegen_flags: <defaults>
</compile_context>

<pallas_src>
import jax
import jax.numpy as jnp
from jax.experimental import pallas as pl
from jax.experimental.pallas import tpu as pltpu


def _linear_vpu_kernel(w_ref, b_ref, x_ref, o_ref):
    # w_ref: SMEM (3,)   -- flattened nn.Linear weight (out_features=1, in_features=3)
    # b_ref: SMEM (1,)   -- bias
    # x_ref: VMEM (3, TILE_N) -- lane-dense, transposed input tile
    # o_ref: VMEM (1, TILE_N) -- lane-dense output tile
    w0 = w_ref[0]
    w1 = w_ref[1]
    w2 = w_ref[2]
    b = b_ref[0]
    # K=3 contraction as explicit mul+add on the VPU (no MXU pass, no XLU reduce).
    acc = x_ref[0:1, :] * w0 + x_ref[1:2, :] * w1 + x_ref[2:3, :] * w2 + b
    o_ref[...] = acc.astype(o_ref.dtype)


def binary_classifier_forward(x, weight, bias, *, tile_n=8192):
    """Pallas equivalent of torch.nn.Linear(3, 1)(x).

    x: (N, 3) f32, weight: (1, 3) f32, bias: (1,) f32  ->  (N, 1) f32.
    """
    N, K = x.shape
    M, Kw = weight.shape
    assert K == Kw == 3 and M == 1
    assert tile_n % 128 == 0

    # Pick a lane-aligned tile: big tiles amortize the ~0.35 us per-step cost;
    # a (3, tile)+(1, tile) f32 pair is only ~128 KiB double-buffered, far under
    # the v7x 32 MiB scoped-VMEM default, so no vmem_limit override is needed.
    lane = 128
    if N <= tile_n:
        tile = max(lane, ((N + lane - 1) // lane) * lane)
    else:
        tile = tile_n
    n_pad = ((N + tile - 1) // tile) * tile
    grid = (n_pad // tile,)

    # Lane-dense layout: pad the batch dim and transpose in the wrapper so the
    # batch rides the 128-lane axis inside the kernel (unmasked vld/vst).
    x_pad = jnp.pad(x, ((0, n_pad - N), (0, 0)))
    xT = x_pad.T  # (3, n_pad)
    w_flat = weight.reshape(K)  # (3,)

    out = pl.pallas_call(
        _linear_vpu_kernel,
        out_shape=jax.ShapeDtypeStruct((1, n_pad), x.dtype),
        grid=grid,
        in_specs=[
            pl.BlockSpec(memory_space=pltpu.MemorySpace.SMEM),  # weight (3,)
            pl.BlockSpec(memory_space=pltpu.MemorySpace.SMEM),  # bias (1,)
            pl.BlockSpec((K, tile), lambda i: (0, i)),          # xT tile
        ],
        out_specs=pl.BlockSpec((1, tile), lambda i: (0, i)),
        compiler_params=pltpu.CompilerParams(
            dimension_semantics=("parallel",),  # shards across TCs on v7x
        ),
        cost_estimate=pl.CostEstimate(
            flops=5 * n_pad,
            transcendentals=0,
            bytes_accessed=(K + 1) * n_pad * 4 + (K + 1) * 4,
        ),
    )(w_flat, bias, xT)

    # Un-pad and restore PyTorch's (N, 1) output layout.
    return out[0, :N].reshape(N, 1)


if __name__ == "__main__":
    key = jax.random.PRNGKey(0)
    kx, kw, kb = jax.random.split(key, 3)

    # Small shapes consistent with the module: batch=8, in_features=3, out_features=1.
    N, K, M = 8, 3, 1
    x = jax.random.normal(kx, (N, K), dtype=jnp.float32)

    # Deterministic parameter init (mimics nn.Linear default uniform(-1/sqrt(K), 1/sqrt(K))).
    bound = 1.0 / (K ** 0.5)
    weight = jax.random.uniform(kw, (M, K), dtype=jnp.float32, minval=-bound, maxval=bound)
    bias = jax.random.uniform(kb, (M,), dtype=jnp.float32, minval=-bound, maxval=bound)

    out = binary_classifier_forward(x, weight, bias)
    jax.block_until_ready(out)

    # Reference check against plain JAX (same semantics as torch.nn.Linear).
    ref = x @ weight.T + bias
    assert out.shape == (N, M)
    assert jnp.allclose(out, ref, atol=1e-5, rtol=1e-5)

    print("KERNEL_OK")
</pallas_src>

<mosaic_0001>
module attributes {stable_mosaic.version = 11 : i64} {
  func.func @_linear_vpu_kernel(%arg0: i32, %arg1: memref<3xf32, #tpu.memory_space<smem>>, %arg2: memref<1xf32, #tpu.memory_space<smem>>, %arg3: memref<3x128xf32, #tpu.memory_space<vmem>>, %arg4: memref<1x128xf32, #tpu.memory_space<vmem>>) attributes {dimension_semantics = [#tpu.dimension_semantics<parallel>], iteration_bounds = array<i64: 1>, scalar_prefetch = 0 : i64, scratch_operands = 0 : i64, tpu.core_type = #tpu.core_type<tc>, window_params = [{transform_indices = @transform_0, window_bounds = array<i64: 3>}, {transform_indices = @transform_1, window_bounds = array<i64: 1>}, {transform_indices = @transform_2, window_bounds = array<i64: 3, 128>}, {transform_indices = @transform_3, window_bounds = array<i64: 1, 128>}]} {
    %c0 = arith.constant 0 : index
    %0 = memref.load %arg1[%c0] : memref<3xf32, #tpu.memory_space<smem>>
    %c1 = arith.constant 1 : index
    %1 = memref.load %arg1[%c1] : memref<3xf32, #tpu.memory_space<smem>>
    %c2 = arith.constant 2 : index
    %2 = memref.load %arg1[%c2] : memref<3xf32, #tpu.memory_space<smem>>
    %c0_0 = arith.constant 0 : index
    %3 = memref.load %arg2[%c0_0] : memref<1xf32, #tpu.memory_space<smem>>
    %c0_1 = arith.constant 0 : index
    %c0_2 = arith.constant 0 : index
    %4 = vector.load %arg3[%c0_1, %c0_2] : memref<3x128xf32, #tpu.memory_space<vmem>>, vector<1x128xf32>
    %5 = vector.broadcast %0 : f32 to vector<1x128xf32>
    %6 = arith.mulf %4, %5 : vector<1x128xf32>
    %c1_3 = arith.constant 1 : index
    %c0_4 = arith.constant 0 : index
    %7 = vector.load %arg3[%c1_3, %c0_4] : memref<3x128xf32, #tpu.memory_space<vmem>>, vector<1x128xf32>
    %8 = vector.broadcast %1 : f32 to vector<1x128xf32>
    %9 = arith.mulf %7, %8 : vector<1x128xf32>
    %10 = arith.addf %6, %9 : vector<1x128xf32>
    %c2_5 = arith.constant 2 : index
    %c0_6 = arith.constant 0 : index
    %11 = vector.load %arg3[%c2_5, %c0_6] : memref<3x128xf32, #tpu.memory_space<vmem>>, vector<1x128xf32>
    %12 = vector.broadcast %2 : f32 to vector<1x128xf32>
    %13 = arith.mulf %11, %12 : vector<1x128xf32>
    %14 = arith.addf %10, %13 : vector<1x128xf32>
    %15 = vector.broadcast %3 : f32 to vector<1x128xf32>
    %16 = arith.addf %14, %15 : vector<1x128xf32>
    %c0_7 = arith.constant 0 : index
    %c0_8 = arith.constant 0 : index
    %17 = vector.load %arg4[%c0_7, %c0_8] : memref<1x128xf32, #tpu.memory_space<vmem>>, vector<1x128xf32>
    tpu.vector_store %arg4[%c0_7, %c0_8], %16 {strides = array<i32>} : memref<1x128xf32, #tpu.memory_space<vmem>>, vector<1x128xf32>,
    return
  }
  func.func @transform_0(%arg0: i32) -> i32 {
    %c0_i32 = arith.constant 0 : i32
    %c0_i32_0 = arith.constant 0 : i32
    return %c0_i32 : i32
  }
  func.func @transform_1(%arg0: i32) -> i32 {
    %c0_i32 = arith.constant 0 : i32
    %c0_i32_0 = arith.constant 0 : i32
    return %c0_i32 : i32
  }
  func.func @transform_2(%arg0: i32) -> (i32, i32) {
    %c0_i32 = arith.constant 0 : i32
    %c0_i32_0 = arith.constant 0 : i32
    return %c0_i32, %arg0 : i32, i32
  }
  func.func @transform_3(%arg0: i32) -> (i32, i32) {
    %c0_i32 = arith.constant 0 : i32
    %c0_i32_0 = arith.constant 0 : i32
    return %c0_i32, %arg0 : i32, i32
  }
}

</mosaic_0001>

<bundles_post_ra>
// kernel: tpu_custom_call.1
= control target key start
LH: loop header
LB: loop body
LE: loop exit
PB: predicated region body
PF: predicated region fallthrough
CT: control target
= control target key end

     0   :  { %9 = vsyncpa [#allocation6], 0  ;;  %s173_s0 = inlined_call_operand.vmem [shape: f32[3], index: 0, kind: input, shape index: {}]   ;;  %s174_s1 = inlined_call_operand.<no memory space> [shape: f32[1], index: 1, kind: input, shape index: {}]   ;;  %s175_s2 = inlined_call_operand.hbm [shape: f32[3,128], index: 2, kind: input, shape index: {}]   ;;  %s176_s3 = inlined_call_operand.hbm [shape: f32[1,128], index: 3, kind: output, shape index: {}]  }
   0x1   :  { %10 = vsyncpa [#allocation4], 0 }
   0x2   :  { %11 = vsyncpa [#allocation5], 0  ;;  %s18_s14 = sshll.u32 %s173_s0, 4  ;;  %s19_s14 = int_to_ptr.vmem [resolvable:$true] %s18_s14 }
   0x3   :  { %s80_s15 = scalar_lea.vmem %s19_s14, 16  ;;  %p85_p1 = scmp.lt.s32.totalorder %s19_s14, %s19_s14 }
   0x4   :  { %p81_p0 = scmp.ne.s32.totalorder %s19_s14, %s80_s15  ;;  %p86_p2 = scmp.lt.s32.totalorder %s80_s15, %s80_s15 }
   0x6   :  { %p87_p3 = por %p86_p2, %p85_p1 }
   0x8   :  { %p88_p4 = pnand %p87_p3, %p81_p0 }
   0xa   :  { %91 = shalt.err (!%p88_p4)
}
   0xb   :  { %s138_s16 = smov [#allocation3]   ;;  %s139_s17 = smov [#allocation7]  }
   0xc   :  { %21 = dma.vmem_to_smem %s19_s14, 16, %s138_s16, [#allocation6]  }
   0xd   :  { %s30_s18 = sshll.u32 %s139_s17, 4  ;;  %s31_s18 = int_to_ptr.vmem [resolvable:$true] %s30_s18 }
   0xe   :  { %s100_s19 = scalar_lea.vmem %s31_s18, 64  ;;  %p105_p6 = scmp.lt.s32.totalorder %s31_s18, %s31_s18 }
   0xf   :  { %p101_p5 = scmp.ne.s32.totalorder %s31_s18, %s100_s19  ;;  %p106_p7 = scmp.lt.s32.totalorder %s100_s19, %s100_s19 }
  0x11   :  { %p107_p8 = por %p106_p7, %p105_p6 }
  0x13   :  { %p108_p9 = pnand %p107_p8, %p101_p5 }
  0x15   :  { %111 = shalt.err (!%p108_p9)
}
  0x16   :  { %33 = dma.hbm_to_vmem [thread:$0]  %s175_s2, 64, %s31_s18, [#allocation4]  }
  0x17   :  { %132 = dma.done.wait [#allocation6], 16  }
  0x18   :  { %133 = vsyncadd [#allocation6], 4294967280 }
  0x19   :  { %134 = dma.done.wait [#allocation4], 64  }
  0x1a   :  { %135 = vsyncadd [#allocation4], 4294967232 }
  0x1b   :  { %40 = sfence }
  0x1c   :  { %s41_s21 = sld [smem:[#allocation3]]  ;;  %v45_v0 = vld [vmem:[#allocation7] sm:$0x1]  ;;  %v48_v1 = vld [vmem:[#allocation7 + $0x1] sm:$0x1]  ;;  %v56_v10 = vstv %s174_s1  ;;  %s140_s25 = smov [#allocation8]  }
  0x1d   :  { %s75_s22 = sld [smem:[#allocation3 + $0x1]]  ;;  %v52_v3 = vld [vmem:[#allocation7 + $0x2] sm:$0x1]  ;;  %s65_s26 = sshll.u32 %s140_s25, 4  ;;  %s66_s26 = int_to_ptr.vmem [resolvable:$true] %s65_s26 }
  0x1e   :  { %s76_s23 = sld [smem:[#allocation3 + $0x2]]  ;;  %s112_s27 = scalar_lea.vmem %s66_s26, 16 }
  0x1f   :  { %p113_p10 = scmp.ne.s32.totalorder %s66_s26, %s112_s27  ;;  %s116_s28 = scalar_lea.vmem %s66_s26, 32 }
  0x20   :  { %p117_p11 = scmp.lt.s32.totalorder %s66_s26, %s66_s26  ;;  %p118_p12 = scmp.lt.s32.totalorder %s116_s28, %s112_s27 }
  0x22   :  { %v46_v2 = vstv %s41_s21  ;;  %p119_p13 = por %p118_p12, %p117_p11 }
  0x23   :  { %v47_v4 = vmul.f32 %v46_v2, %v45_v0  ;;  %v49_v5 = vstv %s75_s22 }
  0x24   :  { %v50_v6 = vmul.f32 %v49_v5, %v48_v1  ;;  %v53_v7 = vstv %s76_s23  ;;  %p120_p0 = pnand %p119_p13, %p113_p10 }
  0x25   :  { %v54_v8 = vmul.f32 %v53_v7, %v52_v3 }
  0x26   :  { %v51_v9 = vadd.f32 %v50_v6, %v47_v4 }
  0x28   :  { %v55_v11 = vadd.f32 %v54_v8, %v51_v9 }
  0x2a   :  { %v57_v12 = vadd.f32 %v56_v10, %v55_v11 }
  0x2c   :  { %58 = vst [vmem:[#allocation8] sm:$0x1] %v57_v12 }
  0x2d   :  { %123 = shalt.err (!%p120_p0)
}
  0x2e   :  { %68 = dma.vmem_to_hbm [thread:$0]  %s66_s26, 16, %s176_s3, [#allocation5]  }
  0x2f   :  { %136 = dma.done.wait [#allocation5], 16  }
  0x30   :  { %137 = vsyncadd [#allocation5], 4294967280 }
  0x31   :  { %72 = vsyncpa [#allocation4], 1 }
  0x32   :  { %73 = vsyncpa [#allocation5], 1 }
  0x33   :  { %74 = vsyncpa [#allocation6], 1 }

</bundles_post_ra>
